<compile_context>
chip_gen: v5e
topology: v5e:2x2
jax: 0.10.0
libtpu: 0.0.40
codegen_flags: <defaults>
</compile_context>

<pallas_src>
import functools

import jax
import jax.numpy as jnp
from jax import lax
from jax.experimental import pallas as pl
from jax.experimental.pallas import tpu as pltpu


def _impala_res_block_kernel(x_ref, w0_ref, b0_ref, w1_ref, b1_ref, o_ref, *,
                             H, W, B, compute_dtype):
    # x_ref : (B, Cp, H*W)   B images; channels on sublanes, flattened spatial on lanes
    # w*_ref: (Cp, 9*Cp)     im2col weight matrix (compute_dtype), row = output channel
    # b*_ref: (Cp, 1)        bias column (f32)
    # o_ref : (B, Cp, H*W)
    HW = H * W

    # Border masks from the flattened spatial coordinate (no integer divide):
    #   top/bottom depend only on the flat index, left/right only on the column (one mod).
    col = lax.broadcasted_iota(jnp.int32, (1, HW), 1)
    ww = col % W
    top_ok = col >= W                 # row > 0
    bot_ok = col < (HW - W)           # row < H-1
    left_ok = ww > 0                  # col > 0
    right_ok = ww < (W - 1)           # col < W-1

    # The 9 conv taps: lane-roll offset + zero-padding validity mask.  Built once per grid
    # step and reused by both convs and all B images.
    taps = []
    for kh in range(3):
        for kw in range(3):
            di, dj = kh - 1, kw - 1
            if di == 0 and dj == 0:
                taps.append((0, None))            # center tap: no shift, no mask
                continue
            m = None
            if di == -1:
                m = top_ok
            elif di == 1:
                m = bot_ok
            if dj == -1:
                m = left_ok if m is None else (m & left_ok)
            elif dj == 1:
                m = right_ok if m is None else (m & right_ok)
            taps.append((di * W + dj, m))

    # Weights / biases loaded once per grid step (weights already in compute_dtype).
    w0 = w0_ref[...]
    w1 = w1_ref[...]
    b0 = b0_ref[...]
    b1 = b1_ref[...]

    def conv3x3(act, w, b):
        # act: (Cp, HW) in compute_dtype  ->  (Cp, HW) f32
        blocks = []
        for off, m in taps:
            if off == 0:
                blocks.append(act)
            else:
                # result[p] = act[p + off]; out-of-image positions masked to zero (padding=1).
                shifted = pltpu.roll(act, (-off) % HW, axis=1)
                blocks.append(jnp.where(m, shifted, jnp.zeros_like(shifted)))
        patches = jnp.concatenate(blocks, axis=0)                    # (9*Cp, HW), compute_dtype
        y = jnp.dot(w, patches, preferred_element_type=jnp.float32)  # (Cp, HW), f32 accum
        return y + b                                                 # f32 bias add

    def body(bi, carry):
        x = x_ref[bi]                                                # (Cp, HW), io dtype
        a0 = jnp.maximum(x, jnp.zeros((), x.dtype)).astype(compute_dtype)
        y0 = conv3x3(a0, w0, b0)                                     # f32
        a1 = jnp.maximum(y0, 0.0).astype(compute_dtype)              # cast BEFORE rolls
        y1 = conv3x3(a1, w1, b1)                                     # f32
        o_ref[bi] = (y1 + x.astype(jnp.float32)).astype(o_ref.dtype) # residual = pre-ReLU x
        return carry

    lax.fori_loop(0, B, body, 0, unroll=(B <= 4))


@functools.partial(jax.jit, static_argnames=("compute_dtype", "batch_block"))
def impala_residual_block(x_nchw, w0, b0, w1, b1, *,
                          compute_dtype=jnp.bfloat16, batch_block=None):
    """x_nchw: (N, C, H, W).  w0/w1: (3, 3, Cin, Cout) in HWIO.  b0/b1: (C,).

    (PyTorch Conv2d weights are OIHW; convert with w.permute(2, 3, 1, 0) to HWIO.)
    Returns (N, C, H, W) in `compute_dtype` (f32 when compute_dtype == float32).
    """
    N, C, H, W = x_nchw.shape
    assert w0.shape == (3, 3, C, C) and w1.shape == (3, 3, C, C), \
        "ImpalaResidualBlock requires Cin == Cout == channels"
    HW = H * W

    io_dtype = compute_dtype
    # Sublane tile: 8 for f32, 16 for bf16 (packed) — keeps the 9-way concat tile aligned.
    sub = 8 if jnp.dtype(compute_dtype) == jnp.dtype(jnp.float32) else 16
    Cp = ((C + sub - 1) // sub) * sub

    # ---- operand prep (wrapper-side XLA; cheap/contiguous) -------------------------------
    x = x_nchw.astype(io_dtype)
    if Cp != C:
        x = jnp.pad(x, ((0, 0), (0, Cp - C), (0, 0), (0, 0)))
    x = x.reshape(N, Cp, HW)                                         # free reshape, stays NCHW

    def as_matrix(w):                         # (3,3,Cin,Cout) HWIO -> (Cp, 9*Cp) compute_dtype
        wt = jnp.transpose(w, (3, 0, 1, 2))   # (Cout, 3, 3, Cin)
        if Cp != C:
            wt = jnp.pad(wt, ((0, Cp - C), (0, 0), (0, 0), (0, Cp - C)))
        return wt.reshape(Cp, 9 * Cp).astype(compute_dtype)          # pre-cast (no in-kernel cast)

    def as_col(b):                            # (C,) -> (Cp, 1) f32
        bc = b.astype(jnp.float32)
        if Cp != C:
            bc = jnp.pad(bc, ((0, Cp - C),))
        return bc.reshape(Cp, 1)

    w0_mat, w1_mat = as_matrix(w0), as_matrix(w1)
    b0_col, b1_col = as_col(b0), as_col(b1)

    # ---- pick B (images per grid step) from a VMEM budget --------------------------------
    io_isz = jnp.dtype(io_dtype).itemsize
    cd_isz = jnp.dtype(compute_dtype).itemsize
    per_image_block = Cp * HW * io_isz                    # one (Cp, HW) image block
    fixed = (2 * Cp * 9 * Cp * cd_isz + 2 * Cp * 4        # weights + biases
             + 9 * Cp * HW * cd_isz                        # im2col slab (per image, reused)
             + 4 * Cp * HW * 4)                            # f32 temporaries (per image)
    budget = 24 * 1024 * 1024                              # safe within v7x scoped VMEM
    b_vmem = max(1, (budget - fixed) // (4 * per_image_block))  # in+out, double buffered
    b_steps = max(1, -(-N // 2))                           # keep >= 2 grid steps for megacore
    B = int(max(1, min(b_vmem, b_steps, N, 8)))
    if batch_block is not None:
        B = int(batch_block)

    n_steps = -(-N // B)
    Npad = n_steps * B
    if Npad != N:
        x = jnp.pad(x, ((0, Npad - N), (0, 0), (0, 0)))

    out = pl.pallas_call(
        functools.partial(_impala_res_block_kernel, H=H, W=W, B=B,
                          compute_dtype=compute_dtype),
        out_shape=jax.ShapeDtypeStruct((Npad, Cp, HW), io_dtype),
        grid_spec=pltpu.PrefetchScalarGridSpec(
            num_scalar_prefetch=0,
            grid=(n_steps,),
            in_specs=[
                pl.BlockSpec((B, Cp, HW), lambda n: (n, 0, 0)),
                pl.BlockSpec((Cp, 9 * Cp), lambda n: (0, 0)),
                pl.BlockSpec((Cp, 1), lambda n: (0, 0)),
                pl.BlockSpec((Cp, 9 * Cp), lambda n: (0, 0)),
                pl.BlockSpec((Cp, 1), lambda n: (0, 0)),
            ],
            out_specs=pl.BlockSpec((B, Cp, HW), lambda n: (n, 0, 0)),
        ),
        compiler_params=pltpu.CompilerParams(
            dimension_semantics=("parallel",),           # batch blocks shard across TCs (v7x)
            vmem_limit_bytes=32 * 1024 * 1024,           # explicit cap, fits v7x scoped VMEM
        ),
    )(x, w0_mat, b0_col, w1_mat, b1_col)

    return out[:N, :C, :].reshape(N, C, H, W)


def _reference(x_nchw, w0, b0, w1, b1):
    """Pure-JAX reference matching the PyTorch forward (f32)."""
    x = jnp.transpose(x_nchw, (0, 2, 3, 1))
    dn = ("NHWC", "HWIO", "NHWC")

    def conv(a, w, b):
        return lax.conv_general_dilated(
            a, w, window_strides=(1, 1), padding="SAME", dimension_numbers=dn,
        ) + b

    a0 = jnp.maximum(x, 0.0)
    y0 = conv(a0, w0, b0)
    a1 = jnp.maximum(y0, 0.0)
    y1 = conv(a1, w1, b1)
    return jnp.transpose(y1 + x, (0, 3, 1, 2))


def _init_params(key, C):
    # PyTorch Conv2d default init: U(-bound, bound), bound = 1/sqrt(fan_in), fan_in = C*3*3.
    k0w, k0b, k1w, k1b = jax.random.split(key, 4)
    bound = float(C * 3 * 3) ** -0.5
    w0 = jax.random.uniform(k0w, (3, 3, C, C), jnp.float32, -bound, bound)
    b0 = jax.random.uniform(k0b, (C,), jnp.float32, -bound, bound)
    w1 = jax.random.uniform(k1w, (3, 3, C, C), jnp.float32, -bound, bound)
    b1 = jax.random.uniform(k1b, (C,), jnp.float32, -bound, bound)
    return w0, b0, w1, b1


if __name__ == "__main__":
    key = jax.random.PRNGKey(0)
    kx1, kp1, kx2, kp2 = jax.random.split(key, 4)

    # Test 1: batch=2, channels=4, spatial=16x16 (C padded 4->8/16, grid of 2 steps).
    N, C, H, W = 2, 4, 16, 16
    x = jax.random.normal(kx1, (N, C, H, W), dtype=jnp.float32)
    w0, b0, w1, b1 = _init_params(kp1, C)
    ref = _reference(x, w0, b0, w1, b1)

    # f32 path: must match the f32 reference tightly.
    out_f32 = jax.block_until_ready(
        impala_residual_block(x, w0, b0, w1, b1, compute_dtype=jnp.float32))
    assert out_f32.shape == (N, C, H, W)
    assert jnp.allclose(out_f32, ref, atol=1e-4, rtol=1e-4), "f32 kernel mismatch vs reference"

    # bf16 path (production default): bf16 patch build, bf16 weights & I/O, f32 accum/residual.
    out_bf16 = jax.block_until_ready(impala_residual_block(x, w0, b0, w1, b1))
    assert jnp.allclose(out_bf16.astype(jnp.float32), ref, atol=5e-2, rtol=5e-2), \
        "bf16 kernel mismatch vs reference"

    # Test 2: exercises B>1 batching inside one grid step and batch padding (N=5 -> B=3, Npad=6).
    N2, C2, H2, W2 = 5, 8, 16, 16
    x2 = jax.random.normal(kx2, (N2, C2, H2, W2), dtype=jnp.float32)
    w20, b20, w21, b21 = _init_params(kp2, C2)
    ref2 = _reference(x2, w20, b20, w21, b21)
    out2 = jax.block_until_ready(
        impala_residual_block(x2, w20, b20, w21, b21, compute_dtype=jnp.float32))
    assert out2.shape == (N2, C2, H2, W2)
    assert jnp.allclose(out2, ref2, atol=1e-4, rtol=1e-4), "batched f32 kernel mismatch vs reference"

    print("KERNEL_OK")
</pallas_src>

<mosaic_0001>
module attributes {stable_mosaic.version = 11 : i64} {
  func.func @_impala_res_block_kernel(%arg0: i32, %arg1: memref<1x8x256xf32, #tpu.memory_space<vmem>>, %arg2: memref<8x72xf32, #tpu.memory_space<vmem>>, %arg3: memref<8x1xf32, #tpu.memory_space<vmem>>, %arg4: memref<8x72xf32, #tpu.memory_space<vmem>>, %arg5: memref<8x1xf32, #tpu.memory_space<vmem>>, %arg6: memref<1x8x256xf32, #tpu.memory_space<vmem>>) attributes {dimension_semantics = [#tpu.dimension_semantics<parallel>], iteration_bounds = array<i64: 2>, scalar_prefetch = 0 : i64, scratch_operands = 0 : i64, tpu.core_type = #tpu.core_type<tc>, window_params = [{transform_indices = @transform_0, window_bounds = array<i64: 1, 8, 256>}, {pipeline_mode = #tpu.pipeline_mode<synchronous>, transform_indices = @transform_1, window_bounds = array<i64: 8, 72>}, {pipeline_mode = #tpu.pipeline_mode<synchronous>, transform_indices = @transform_2, window_bounds = array<i64: 8, 1>}, {pipeline_mode = #tpu.pipeline_mode<synchronous>, transform_indices = @transform_3, window_bounds = array<i64: 8, 72>}, {pipeline_mode = #tpu.pipeline_mode<synchronous>, transform_indices = @transform_4, window_bounds = array<i64: 8, 1>}, {transform_indices = @transform_5, window_bounds = array<i64: 1, 8, 256>}]} {
    %0 = tpu.iota {dimensions = array<i32: 1>} : vector<1x256xi32>
    %c16_i32 = arith.constant 16 : i32
    %c0_i32 = arith.constant 0 : i32
    %1 = arith.cmpi eq, %c16_i32, %c0_i32 : i32
    %c1_i32 = arith.constant 1 : i32
    %2 = arith.select %1, %c1_i32, %c16_i32 : i32
    %3 = vector.broadcast %2 : i32 to vector<1x256xi32>
    %4 = arith.remsi %0, %3 : vector<1x256xi32>
    %c0_i32_0 = arith.constant 0 : i32
    %5 = vector.broadcast %c0_i32_0 : i32 to vector<1x256xi32>
    %6 = arith.cmpi ne, %4, %5 : vector<1x256xi32>
    %c0_i32_1 = arith.constant 0 : i32
    %7 = vector.broadcast %c0_i32_1 : i32 to vector<1x256xi32>
    %8 = arith.cmpi slt, %4, %7 : vector<1x256xi32>
    %c0_i32_2 = arith.constant 0 : i32
    %9 = arith.cmpi slt, %2, %c0_i32_2 : i32
    %10 = vector.broadcast %9 : i1 to vector<1x256xi1>
    %11 = vector.broadcast %10 : vector<1x256xi1> to vector<1x256xi1>
    %12 = arith.xori %8, %11 : vector<1x256xi1>
    %13 = arith.andi %12, %6 : vector<1x256xi1>
    %14 = vector.broadcast %2 : i32 to vector<1x256xi32>
    %15 = arith.addi %4, %14 : vector<1x256xi32>
    %16 = arith.select %13, %15, %4 : vector<1x256xi1>, vector<1x256xi32>
    %c16_i32_3 = arith.constant 16 : i32
    %17 = vector.broadcast %c16_i32_3 : i32 to vector<1x256xi32>
    %18 = arith.cmpi sge, %0, %17 : vector<1x256xi32>
    %c240_i32 = arith.constant 240 : i32
    %19 = vector.broadcast %c240_i32 : i32 to vector<1x256xi32>
    %20 = arith.cmpi slt, %0, %19 : vector<1x256xi32>
    %c0_i32_4 = arith.constant 0 : i32
    %21 = vector.broadcast %c0_i32_4 : i32 to vector<1x256xi32>
    %22 = arith.cmpi sgt, %16, %21 : vector<1x256xi32>
    %c15_i32 = arith.constant 15 : i32
    %23 = vector.broadcast %c15_i32 : i32 to vector<1x256xi32>
    %24 = arith.cmpi slt, %16, %23 : vector<1x256xi32>
    %25 = arith.andi %18, %22 : vector<1x256xi1>
    %26 = arith.andi %18, %24 : vector<1x256xi1>
    %27 = arith.andi %20, %22 : vector<1x256xi1>
    %28 = arith.andi %20, %24 : vector<1x256xi1>
    %c0 = arith.constant 0 : index
    %c0_5 = arith.constant 0 : index
    %29 = vector.load %arg2[%c0, %c0_5] : memref<8x72xf32, #tpu.memory_space<vmem>>, vector<8x72xf32>
    %c0_6 = arith.constant 0 : index
    %c0_7 = arith.constant 0 : index
    %30 = vector.load %arg4[%c0_6, %c0_7] : memref<8x72xf32, #tpu.memory_space<vmem>>, vector<8x72xf32>
    %c0_8 = arith.constant 0 : index
    %c0_9 = arith.constant 0 : index
    %31 = vector.load %arg3[%c0_8, %c0_9] : memref<8x1xf32, #tpu.memory_space<vmem>>, vector<8x1xf32>
    %c0_10 = arith.constant 0 : index
    %c0_11 = arith.constant 0 : index
    %32 = vector.load %arg5[%c0_10, %c0_11] : memref<8x1xf32, #tpu.memory_space<vmem>>, vector<8x1xf32>
    %c0_i32_12 = arith.constant 0 : i32
    %33 = arith.index_cast %c0_i32_12 : i32 to index
    %c0_13 = arith.constant 0 : index
    %c0_14 = arith.constant 0 : index
    %34 = vector.load %arg1[%33, %c0_13, %c0_14] : memref<1x8x256xf32, #tpu.memory_space<vmem>>, vector<1x8x256xf32>
    %35 = vector.shape_cast %34 : vector<1x8x256xf32> to vector<8x256xf32>
    %cst = arith.constant 0.000000e+00 : f32
    %36 = vector.broadcast %cst : f32 to vector<8x256xf32>
    %37 = arith.maximumf %35, %36 : vector<8x256xf32>
    %c17_i32 = arith.constant 17 : i32
    %38 = tpu.dynamic_rotate %37 by %c17_i32 dim 1 : vector<8x256xf32>, i32 -> vector<8x256xf32>
    %cst_15 = arith.constant 0.000000e+00 : f32
    %39 = vector.broadcast %cst_15 : f32 to vector<8x256xf32>
    %40 = vector.shape_cast %25 : vector<1x256xi1> to vector<1x256xi1>
    %41 = vector.broadcast %40 : vector<1x256xi1> to vector<8x256xi1>
    %42 = arith.select %41, %38, %39 : vector<8x256xi1>, vector<8x256xf32>
    %c16_i32_16 = arith.constant 16 : i32
    %43 = tpu.dynamic_rotate %37 by %c16_i32_16 dim 1 : vector<8x256xf32>, i32 -> vector<8x256xf32>
    %cst_17 = arith.constant 0.000000e+00 : f32
    %44 = vector.broadcast %cst_17 : f32 to vector<8x256xf32>
    %45 = vector.shape_cast %18 : vector<1x256xi1> to vector<1x256xi1>
    %46 = vector.broadcast %45 : vector<1x256xi1> to vector<8x256xi1>
    %47 = arith.select %46, %43, %44 : vector<8x256xi1>, vector<8x256xf32>
    %c15_i32_18 = arith.constant 15 : i32
    %48 = tpu.dynamic_rotate %37 by %c15_i32_18 dim 1 : vector<8x256xf32>, i32 -> vector<8x256xf32>
    %cst_19 = arith.constant 0.000000e+00 : f32
    %49 = vector.broadcast %cst_19 : f32 to vector<8x256xf32>
    %50 = vector.shape_cast %26 : vector<1x256xi1> to vector<1x256xi1>
    %51 = vector.broadcast %50 : vector<1x256xi1> to vector<8x256xi1>
    %52 = arith.select %51, %48, %49 : vector<8x256xi1>, vector<8x256xf32>
    %c1_i32_20 = arith.constant 1 : i32
    %53 = tpu.dynamic_rotate %37 by %c1_i32_20 dim 1 : vector<8x256xf32>, i32 -> vector<8x256xf32>
    %cst_21 = arith.constant 0.000000e+00 : f32
    %54 = vector.broadcast %cst_21 : f32 to vector<8x256xf32>
    %55 = vector.shape_cast %22 : vector<1x256xi1> to vector<1x256xi1>
    %56 = vector.broadcast %55 : vector<1x256xi1> to vector<8x256xi1>
    %57 = arith.select %56, %53, %54 : vector<8x256xi1>, vector<8x256xf32>
    %c255_i32 = arith.constant 255 : i32
    %58 = tpu.dynamic_rotate %37 by %c255_i32 dim 1 : vector<8x256xf32>, i32 -> vector<8x256xf32>
    %cst_22 = arith.constant 0.000000e+00 : f32
    %59 = vector.broadcast %cst_22 : f32 to vector<8x256xf32>
    %60 = vector.shape_cast %24 : vector<1x256xi1> to vector<1x256xi1>
    %61 = vector.broadcast %60 : vector<1x256xi1> to vector<8x256xi1>
    %62 = arith.select %61, %58, %59 : vector<8x256xi1>, vector<8x256xf32>
    %c241_i32 = arith.constant 241 : i32
    %63 = tpu.dynamic_rotate %37 by %c241_i32 dim 1 : vector<8x256xf32>, i32 -> vector<8x256xf32>
    %cst_23 = arith.constant 0.000000e+00 : f32
    %64 = vector.broadcast %cst_23 : f32 to vector<8x256xf32>
    %65 = vector.shape_cast %27 : vector<1x256xi1> to vector<1x256xi1>
    %66 = vector.broadcast %65 : vector<1x256xi1> to vector<8x256xi1>
    %67 = arith.select %66, %63, %64 : vector<8x256xi1>, vector<8x256xf32>
    %c240_i32_24 = arith.constant 240 : i32
    %68 = tpu.dynamic_rotate %37 by %c240_i32_24 dim 1 : vector<8x256xf32>, i32 -> vector<8x256xf32>
    %cst_25 = arith.constant 0.000000e+00 : f32
    %69 = vector.broadcast %cst_25 : f32 to vector<8x256xf32>
    %70 = vector.shape_cast %20 : vector<1x256xi1> to vector<1x256xi1>
    %71 = vector.broadcast %70 : vector<1x256xi1> to vector<8x256xi1>
    %72 = arith.select %71, %68, %69 : vector<8x256xi1>, vector<8x256xf32>
    %c239_i32 = arith.constant 239 : i32
    %73 = tpu.dynamic_rotate %37 by %c239_i32 dim 1 : vector<8x256xf32>, i32 -> vector<8x256xf32>
    %cst_26 = arith.constant 0.000000e+00 : f32
    %74 = vector.broadcast %cst_26 : f32 to vector<8x256xf32>
    %75 = vector.shape_cast %28 : vector<1x256xi1> to vector<1x256xi1>
    %76 = vector.broadcast %75 : vector<1x256xi1> to vector<8x256xi1>
    %77 = arith.select %76, %73, %74 : vector<8x256xi1>, vector<8x256xf32>
    %78 = tpu.concatenate %42, %47, %52, %57, %37, %62, %67, %72, %77 in 0 : vector<8x256xf32>, vector<8x256xf32>, vector<8x256xf32>, vector<8x256xf32>, vector<8x256xf32>, vector<8x256xf32>, vector<8x256xf32>, vector<8x256xf32>, vector<8x256xf32> -> vector<72x256xf32>
    %cst_27 = arith.constant dense<0.000000e+00> : vector<8x256xf32>
    %79 = tpu.matmul %29, %78, %cst_27 {dimension_numbers = #tpu.dot_dimension_numbers<[1], [0], [0], [1], [0, 0, 1, 1], [], []>} : vector<8x72xf32>, vector<72x256xf32>, vector<8x256xf32> -> vector<8x256xf32>
    %80 = vector.broadcast %31 : vector<8x1xf32> to vector<8x256xf32>
    %81 = arith.addf %79, %80 : vector<8x256xf32>
    %cst_28 = arith.constant 0.000000e+00 : f32
    %82 = vector.broadcast %cst_28 : f32 to vector<8x256xf32>
    %83 = arith.maximumf %81, %82 : vector<8x256xf32>
    %c17_i32_29 = arith.constant 17 : i32
    %84 = tpu.dynamic_rotate %83 by %c17_i32_29 dim 1 : vector<8x256xf32>, i32 -> vector<8x256xf32>
    %cst_30 = arith.constant 0.000000e+00 : f32
    %85 = vector.broadcast %cst_30 : f32 to vector<8x256xf32>
    %86 = vector.shape_cast %25 : vector<1x256xi1> to vector<1x256xi1>
    %87 = vector.broadcast %86 : vector<1x256xi1> to vector<8x256xi1>
    %88 = arith.select %87, %84, %85 : vector<8x256xi1>, vector<8x256xf32>
    %c16_i32_31 = arith.constant 16 : i32
    %89 = tpu.dynamic_rotate %83 by %c16_i32_31 dim 1 : vector<8x256xf32>, i32 -> vector<8x256xf32>
    %cst_32 = arith.constant 0.000000e+00 : f32
    %90 = vector.broadcast %cst_32 : f32 to vector<8x256xf32>
    %91 = vector.shape_cast %18 : vector<1x256xi1> to vector<1x256xi1>
    %92 = vector.broadcast %91 : vector<1x256xi1> to vector<8x256xi1>
    %93 = arith.select %92, %89, %90 : vector<8x256xi1>, vector<8x256xf32>
    %c15_i32_33 = arith.constant 15 : i32
    %94 = tpu.dynamic_rotate %83 by %c15_i32_33 dim 1 : vector<8x256xf32>, i32 -> vector<8x256xf32>
    %cst_34 = arith.constant 0.000000e+00 : f32
    %95 = vector.broadcast %cst_34 : f32 to vector<8x256xf32>
    %96 = vector.shape_cast %26 : vector<1x256xi1> to vector<1x256xi1>
    %97 = vector.broadcast %96 : vector<1x256xi1> to vector<8x256xi1>
    %98 = arith.select %97, %94, %95 : vector<8x256xi1>, vector<8x256xf32>
    %c1_i32_35 = arith.constant 1 : i32
    %99 = tpu.dynamic_rotate %83 by %c1_i32_35 dim 1 : vector<8x256xf32>, i32 -> vector<8x256xf32>
    %cst_36 = arith.constant 0.000000e+00 : f32
    %100 = vector.broadcast %cst_36 : f32 to vector<8x256xf32>
    %101 = vector.shape_cast %22 : vector<1x256xi1> to vector<1x256xi1>
    %102 = vector.broadcast %101 : vector<1x256xi1> to vector<8x256xi1>
    %103 = arith.select %102, %99, %100 : vector<8x256xi1>, vector<8x256xf32>
    %c255_i32_37 = arith.constant 255 : i32
    %104 = tpu.dynamic_rotate %83 by %c255_i32_37 dim 1 : vector<8x256xf32>, i32 -> vector<8x256xf32>
    %cst_38 = arith.constant 0.000000e+00 : f32
    %105 = vector.broadcast %cst_38 : f32 to vector<8x256xf32>
    %106 = vector.shape_cast %24 : vector<1x256xi1> to vector<1x256xi1>
    %107 = vector.broadcast %106 : vector<1x256xi1> to vector<8x256xi1>
    %108 = arith.select %107, %104, %105 : vector<8x256xi1>, vector<8x256xf32>
    %c241_i32_39 = arith.constant 241 : i32
    %109 = tpu.dynamic_rotate %83 by %c241_i32_39 dim 1 : vector<8x256xf32>, i32 -> vector<8x256xf32>
    %cst_40 = arith.constant 0.000000e+00 : f32
    %110 = vector.broadcast %cst_40 : f32 to vector<8x256xf32>
    %111 = vector.shape_cast %27 : vector<1x256xi1> to vector<1x256xi1>
    %112 = vector.broadcast %111 : vector<1x256xi1> to vector<8x256xi1>
    %113 = arith.select %112, %109, %110 : vector<8x256xi1>, vector<8x256xf32>
    %c240_i32_41 = arith.constant 240 : i32
    %114 = tpu.dynamic_rotate %83 by %c240_i32_41 dim 1 : vector<8x256xf32>, i32 -> vector<8x256xf32>
    %cst_42 = arith.constant 0.000000e+00 : f32
    %115 = vector.broadcast %cst_42 : f32 to vector<8x256xf32>
    %116 = vector.shape_cast %20 : vector<1x256xi1> to vector<1x256xi1>
    %117 = vector.broadcast %116 : vector<1x256xi1> to vector<8x256xi1>
    %118 = arith.select %117, %114, %115 : vector<8x256xi1>, vector<8x256xf32>
    %c239_i32_43 = arith.constant 239 : i32
    %119 = tpu.dynamic_rotate %83 by %c239_i32_43 dim 1 : vector<8x256xf32>, i32 -> vector<8x256xf32>
    %cst_44 = arith.constant 0.000000e+00 : f32
    %120 = vector.broadcast %cst_44 : f32 to vector<8x256xf32>
    %121 = vector.shape_cast %28 : vector<1x256xi1> to vector<1x256xi1>
    %122 = vector.broadcast %121 : vector<1x256xi1> to vector<8x256xi1>
    %123 = arith.select %122, %119, %120 : vector<8x256xi1>, vector<8x256xf32>
    %124 = tpu.concatenate %88, %93, %98, %103, %83, %108, %113, %118, %123 in 0 : vector<8x256xf32>, vector<8x256xf32>, vector<8x256xf32>, vector<8x256xf32>, vector<8x256xf32>, vector<8x256xf32>, vector<8x256xf32>, vector<8x256xf32>, vector<8x256xf32> -> vector<72x256xf32>
    %cst_45 = arith.constant dense<0.000000e+00> : vector<8x256xf32>
    %125 = tpu.matmul %30, %124, %cst_45 {dimension_numbers = #tpu.dot_dimension_numbers<[1], [0], [0], [1], [0, 0, 1, 1], [], []>} : vector<8x72xf32>, vector<72x256xf32>, vector<8x256xf32> -> vector<8x256xf32>
    %126 = vector.broadcast %32 : vector<8x1xf32> to vector<8x256xf32>
    %127 = arith.addf %125, %126 : vector<8x256xf32>
    %128 = arith.addf %127, %35 : vector<8x256xf32>
    %129 = arith.index_cast %c0_i32_12 : i32 to index
    %c0_46 = arith.constant 0 : index
    %c0_47 = arith.constant 0 : index
    %130 = vector.load %arg6[%129, %c0_46, %c0_47] : memref<1x8x256xf32, #tpu.memory_space<vmem>>, vector<1x8x256xf32>
    %131 = vector.shape_cast %130 : vector<1x8x256xf32> to vector<8x256xf32>
    %132 = vector.shape_cast %128 : vector<8x256xf32> to vector<1x8x256xf32>
    tpu.vector_store %arg6[%129, %c0_46, %c0_47], %132 {strides = array<i32>} : memref<1x8x256xf32, #tpu.memory_space<vmem>>, vector<1x8x256xf32>,
    %c1_i32_48 = arith.constant 1 : i32
    return
  }
  func.func @transform_0(%arg0: i32) -> (i32, i32, i32) {
    %c0_i32 = arith.constant 0 : i32
    %c0_i32_0 = arith.constant 0 : i32
    %c0_i32_1 = arith.constant 0 : i32
    return %arg0, %c0_i32, %c0_i32_0 : i32, i32, i32
  }
  func.func @transform_1(%arg0: i32) -> (i32, i32) {
    %c0_i32 = arith.constant 0 : i32
    %c0_i32_0 = arith.constant 0 : i32
    %c0_i32_1 = arith.constant 0 : i32
    return %c0_i32, %c0_i32_0 : i32, i32
  }
  func.func @transform_2(%arg0: i32) -> (i32, i32) {
    %c0_i32 = arith.constant 0 : i32
    %c0_i32_0 = arith.constant 0 : i32
    %c0_i32_1 = arith.constant 0 : i32
    return %c0_i32, %c0_i32_0 : i32, i32
  }
  func.func @transform_3(%arg0: i32) -> (i32, i32) {
    %c0_i32 = arith.constant 0 : i32
    %c0_i32_0 = arith.constant 0 : i32
    %c0_i32_1 = arith.constant 0 : i32
    return %c0_i32, %c0_i32_0 : i32, i32
  }
  func.func @transform_4(%arg0: i32) -> (i32, i32) {
    %c0_i32 = arith.constant 0 : i32
    %c0_i32_0 = arith.constant 0 : i32
    %c0_i32_1 = arith.constant 0 : i32
    return %c0_i32, %c0_i32_0 : i32, i32
  }
  func.func @transform_5(%arg0: i32) -> (i32, i32, i32) {
    %c0_i32 = arith.constant 0 : i32
    %c0_i32_0 = arith.constant 0 : i32
    %c0_i32_1 = arith.constant 0 : i32
    return %arg0, %c0_i32, %c0_i32_0 : i32, i32, i32
  }
}

</mosaic_0001>

<bundles_post_ra>
// kernel: impala_residual_block.1
= control target key start
LH: loop header
LB: loop body
LE: loop exit
PB: predicated region body
PF: predicated region fallthrough
CT: control target
= control target key end

     0   :  { %s713_s18 = smov 0   ;;  %s1000_s0 = inlined_call_operand.vmem [shape: f32[2,8,256], index: 0, kind: input, shape index: {}]   ;;  %s1001_s1 = inlined_call_operand.vmem [shape: f32[8,72], index: 1, kind: input, shape index: {}]   ;;  %s1002_s2 = inlined_call_operand.vmem [shape: f32[8,1], index: 2, kind: input, shape index: {}]   ;;  %s1003_s3 = inlined_call_operand.vmem [shape: f32[8,72], index: 3, kind: input, shape index: {}]   ;;  %s1004_s4 = inlined_call_operand.vmem [shape: f32[8,1], index: 4, kind: input, shape index: {}]   ;;  %s1005_s5 = inlined_call_operand.vmem [shape: f32[2,8,256], index: 5, kind: output, shape index: {}]  }
   0x1 LB: > { %s602_s19 = sadd.s32 4294967295, %s672_s18   ;;  %p606_p0 = scmp.ge.s32.totalorder %s672_s18, 1  ;;  %s672_s18 = sphi %s713_s18, %s15_s18  }
   0x2   : > { %p187_p1 = scmp.lt.s32.totalorder %s672_s18, 3 }
   0x4   : > { %p188_p2 = pnand %p606_p0, %p187_p1 }
   0x5   : > { %p215_p3 = scmp.lt.s32.totalorder (!%p188_p2), %s602_s19, 1  ;;  %s674_s24 = smov (!%p188_p2), 112  }
   0x6   : > { %191 = sbr.rel (%p188_p2) target bundleno = 594 (0x252), region = 40  ;;  %s675_s25 = smov (!%p188_p2), 111  }
   0x7   : > { %s676_s26 = smov (!%p188_p2), 113   ;;  %s677_s27 = smov (!%p188_p2), 127  }
   0x8   : > { %s678_s28 = smov (!%p188_p2), 1   ;;  %s679_s29 = smov (!%p188_p2), 15  }
   0x9   : > { %s680_s30 = smov (!%p188_p2), 16   ;;  %s681_s6 = smov (!%p188_p2), 17  }
   0xb   : > { %s1032_s19 = smov (!%p215_p3, %s602_s19), 1  ;;  %v225_v4 = vlaneseq  ;;  %v270_v26 = vld [vmem:[%s1002_s2] sm:$0xff]  ;;  %v682_v29 = vmov 0  }
   0xc   : > { %s645_s20 = sshll.u32 %s1032_s19, 4  ;;  %664 = vset.pattern.permute.xlu1 %v682_v29  ;;  %665 = vset.pattern.permute.xlu0 %v682_v29  ;;  %v268_v49 = vld [vmem:[%s1001_s1] sm:$0xff] }
   0xd   : > { %s219_s23 = scalar_lea.vmem %s1000_s0, %s645_s20  ;;  %v771_v5 = vand.u32 127, %v225_v4  ;;  %s224_s17 = scalar_lea.vmem %s1005_s5, %s645_s20 }
   0xe   : > { %v729_v0 = vld [vmem:[%s219_s23] sm:$0xff]  ;;  %v738_v2 = vld [vmem:[%s219_s23 + $0x8] sm:$0xff] }
   0xf   : > { %v732_v1 = vmax.f32 %v729_v0, 0.0  ;;  %v743_v3 = vmax.f32 %v738_v2, 0.0  ;;  %v774_v7 = vadd.s32 128, %v771_v5  ;;  %v232_v11 = vand.u32 15, %v771_v5 }
  0x10   : > { %vm371_vm2 = vcmp.lt.s32.totalorder %v771_v5, 111  ;;  %vm358_vm5 = vcmp.lt.s32.totalorder %v771_v5, 112  ;;  %vm345_vm7 = vcmp.lt.s32.totalorder %v771_v5, 113  ;;  %vm332_vm10 = vcmp.lt.s32.totalorder %v771_v5, 127 }
  0x11   : > { %354 = vrot.lane.b32.xlu1 %v732_v1, %s674_s24  ;;  %367 = vrot.lane.b32.xlu0 %v732_v1, %s675_s25  ;;  %v239_v10 = vand.u32 15, %v774_v7  ;;  %vm255_vm0 = vcmp.lt.s32.totalorder %v774_v7, 240  ;;  %vm784_vm3 = vcmp.lt.s32.totalorder %v232_v11, 15  ;;  %vm814_vm8 = vcmp.gt.s32.totalorder %v232_v11, 0 }
  0x12   : > { %341 = vrot.lane.b32.xlu2 %v732_v1, %s676_s26  ;;  %vm1007_vm11 = vcmp.lt.s32.totalorder %v771_v5, 1  ;;  %vm252_vm12 = vcmp.ge.s32.totalorder %v771_v5, 16  ;;  %vm1006_vm13 = vcmp.lt.s32.totalorder %v771_v5, 15  ;;  %vm1008_vm15 = vcmp.lt.s32.totalorder %v771_v5, 16 }
  0x13   : > { %vm779_vm1 = vcmp.lt.s32.totalorder %v239_v10, 15  ;;  %vm797_vm6 = vcmp.gt.s32.totalorder %v239_v10, 0  ;;  %vm861_vm14 = vmand %vm252_vm12, %vm784_vm3 }
  0x14   : > { %vm792_vm4 = vmand %vm255_vm0, %vm779_vm1 }
  0x15   : > { %vm822_vm9 = vmand %vm255_vm0, %vm797_vm6 }
  0x19   : > { %356 = vrot.lane.b32.xlu1 %v743_v3, %s674_s24  ;;  %369 = vrot.lane.b32.xlu0 %v743_v3, %s675_s25 }
  0x1a   : > { %343 = vrot.lane.b32.xlu2 %v743_v3, %s676_s26 }
  0x21   : > { %330 = vrot.lane.b32.xlu1 %v743_v3, %s677_s27  ;;  %328 = vrot.lane.b32.xlu0 %v732_v1, %s677_s27 }
  0x22   : > { %315 = vrot.lane.b32.xlu2 %v732_v1, %s678_s28 }
  0x29   : > { %302 = vrot.lane.b32.xlu1 %v732_v1, %s679_s29  ;;  %317 = vrot.lane.b32.xlu0 %v743_v3, %s678_s28 }
  0x2a   : > { %304 = vrot.lane.b32.xlu2 %v743_v3, %s679_s29 }
  0x31   : > { %291 = vrot.lane.b32.xlu1 %v743_v3, %s680_s30  ;;  %289 = vrot.lane.b32.xlu0 %v732_v1, %s680_s30 }
  0x32   : > { %276 = vrot.lane.b32.xlu2 %v732_v1, %s681_s6 }
  0x39   : > { %278 = vrot.lane.b32.xlu0 %v743_v3, %s681_s6  ;;  %382 = vperm.xlu1 %664, %v270_v26  }
  0x6c   : > { %v342_v6 = vpop.permute.xlu2 %341 }
  0x74   : > { %v344_v12 = vpop.permute.xlu2 %343 }
  0x75   : > { %v346_v27 = vsel %vm345_vm7, %v342_v6, %v344_v12  ;;  %v347_v28 = vsel %vm345_vm7, %v344_v12, %v342_v6 }
  0x7c   : > { %v316_v25 = vpop.permute.xlu2 %315 }
  0x83   : > { %v355_v8 = vpop.permute.xlu1 %354  ;;  %v368_v9 = vpop.permute.xlu0 %367 }
  0x84   : > { %v305_v34 = vpop.permute.xlu2 %304 }
  0x8b   : > { %v357_v16 = vpop.permute.xlu1 %356  ;;  %v370_v17 = vpop.permute.xlu0 %369 }
  0x8c   : > { %v372_v19 = vsel %vm371_vm2, %v368_v9, %v370_v17  ;;  %v373_v20 = vsel %vm371_vm2, %v370_v17, %v368_v9  ;;  %v359_v21 = vsel %vm358_vm5, %v355_v8, %v357_v16  ;;  %v360_v22 = vsel %vm358_vm5, %v357_v16, %v355_v8  ;;  %v277_v46 = vpop.permute.xlu2 %276  ;;  %v271_v8 = vld [vmem:[%s1004_s4] sm:$0xff] }
  0x8d   : > { %611 = vmatpush.msk.msra.mxu0 %vm784_vm3, %v372_v19  ;;  %619 = vmatpush.msk.msra.mxu1 %vm792_vm4, %v373_v20 }
  0x8f   : > { %397 = vmatpush.msra.mxu0 %v359_v21  ;;  %620 = vmatpush.msk.msra.mxu1 %vm255_vm0, %v360_v22 }
  0x91   : > { %612 = vmatpush.msk.msra.mxu0 %vm814_vm8, %v346_v27  ;;  %621 = vmatpush.msk.msra.mxu1 %vm822_vm9, %v347_v28 }
  0x93   : > { %v331_v30 = vpop.permute.xlu1 %330  ;;  %v329_v31 = vpop.permute.xlu0 %328 }
  0x94   : > { %v333_v32 = vsel %vm332_vm10, %v329_v31, %v331_v30  ;;  %v334_v33 = vsel %vm332_vm10, %v331_v30, %v329_v31  ;;  %v269_v31 = vld [vmem:[%s1003_s3] sm:$0xff] }
  0x95   : > { %613 = vmatpush.msk.msra.mxu0 %vm784_vm3, %v333_v32  ;;  %622 = vmatpush.msk.msra.mxu1 %vm779_vm1, %v334_v33 }
  0x97   : > { %400 = vmatpush.msra.mxu0 %v732_v1  ;;  %420 = vmatpush.msra.mxu1 %v743_v3 }
  0x9b   : > { %v303_v35 = vpop.permute.xlu1 %302  ;;  %v318_v36 = vpop.permute.xlu0 %317 }
  0x9c   : > { %v321_v37 = vsel %vm1007_vm11, %v318_v36, %v316_v25  ;;  %v320_v38 = vsel %vm1007_vm11, %v316_v25, %v318_v36  ;;  %v308_v40 = vsel %vm1006_vm13, %v305_v34, %v303_v35  ;;  %v307_v41 = vsel %vm1006_vm13, %v303_v35, %v305_v34  ;;  %vm889_vm11 = vmand %vm252_vm12, %vm814_vm8 }
  0x9d   : > { %614 = vmatpush.msk.msra.mxu0 %vm814_vm8, %v321_v37  ;;  %623 = vmatpush.msk.msra.mxu1 %vm797_vm6, %v320_v38  ;;  %vm280_vm13 = vcmp.lt.s32.totalorder %v771_v5, 17 }
  0x9f   : > { %615 = vmatpush.msk.msra.mxu0 %vm861_vm14, %v308_v40  ;;  %624 = vmatpush.msk.msra.mxu1 %vm779_vm1, %v307_v41 }
  0xa3   : > { %v292_v42 = vpop.permute.xlu1 %291  ;;  %v290_v43 = vpop.permute.xlu0 %289 }
  0xa4   : > { %v295_v44 = vsel %vm1008_vm15, %v292_v42, %v290_v43  ;;  %v294_v45 = vsel %vm1008_vm15, %v290_v43, %v292_v42  ;;  %vm385_vm15 = vcmask 588800  }
  0xa5   : > { %616 = vmatpush.msk.msra.mxu0 %vm252_vm12, %v295_v44  ;;  %423 = vmatpush.msra.mxu1 %v294_v45 }
  0xab   : > { %v279_v48 = vpop.permute.xlu0 %278  ;;  %v383_v52 = vpop.permute.xlu1 %382 }
  0xac   : > { %v282_v50 = vsel %vm280_vm13, %v279_v48, %v277_v46  ;;  %v281_v51 = vsel %vm280_vm13, %v277_v46, %v279_v48 }
  0xad   : > { %617 = vmatpush.msk.msra.mxu0 %vm889_vm11, %v282_v50  ;;  %625 = vmatpush.msk.msra.mxu1 %vm797_vm6, %v281_v51 }
  0xae   : > { %618 = vmatmul.msk.f32.vlgmr.msra.gmra.mxu0 %vm385_vm15, %v268_v49  ;;  %626 = vmatmul.msk.f32.vlgmr.msra.gmra.mxu1 %vm385_vm15, %v268_v49 }
 0x12b   : > { %v406_v53 = vpop.f32.mrf.mxu0  ;;  %v426_v54 = vpop.f32.mrf.mxu1 }
 0x12c   : > { %v407_v55 = vadd.f32 %v406_v53, %v383_v52  ;;  %v427_v56 = vadd.f32 %v426_v54, %v383_v52 }
 0x12e   : > { %v429_v57 = vmax.f32 %v407_v55, 0.0  ;;  %v430_v58 = vmax.f32 %v427_v56, 0.0 }
 0x130   : > { %479 = vrot.lane.b32.xlu1 %v429_v57, %s674_s24  ;;  %487 = vrot.lane.b32.xlu2 %v429_v57, %s675_s25 }
 0x131   : > { %489 = vrot.lane.b32.xlu0 %v430_v58, %s675_s25 }
 0x138   : > { %473 = vrot.lane.b32.xlu1 %v430_v58, %s676_s26  ;;  %481 = vrot.lane.b32.xlu2 %v430_v58, %s674_s24 }
 0x139   : > { %471 = vrot.lane.b32.xlu0 %v429_v57, %s676_s26 }
 0x140   : > { %455 = vrot.lane.b32.xlu1 %v429_v57, %s678_s28  ;;  %463 = vrot.lane.b32.xlu2 %v429_v57, %s677_s27 }
 0x141   : > { %465 = vrot.lane.b32.xlu0 %v430_v58, %s677_s27 }
 0x148   : > { %449 = vrot.lane.b32.xlu1 %v430_v58, %s679_s29  ;;  %457 = vrot.lane.b32.xlu2 %v430_v58, %s678_s28 }
 0x149   : > { %447 = vrot.lane.b32.xlu0 %v429_v57, %s679_s29 }
 0x150   : > { %431 = vrot.lane.b32.xlu1 %v429_v57, %s681_s6  ;;  %439 = vrot.lane.b32.xlu2 %v429_v57, %s680_s30 }
 0x151   : > { %441 = vrot.lane.b32.xlu0 %v430_v58, %s680_s30 }
 0x158   : > { %433 = vrot.lane.b32.xlu2 %v430_v58, %s681_s6 }
 0x159   : > { %497 = vperm.xlu0 %665, %v271_v8  }
 0x18a   : > { %v488_v59 = vpop.permute.xlu2 %487 }
 0x192   : > { %v482_v60 = vpop.permute.xlu2 %481 }
 0x19a   : > { %v464_v6 = vpop.permute.xlu2 %463 }
 0x1a2   : > { %v480_v61 = vpop.permute.xlu1 %479  ;;  %v458_v7 = vpop.permute.xlu2 %457 }
 0x1a3   : > { %v490_v62 = vpop.permute.xlu0 %489  ;;  %v483_v3 = vsel %vm358_vm5, %v480_v61, %v482_v60  ;;  %v484_v4 = vsel %vm358_vm5, %v482_v60, %v480_v61  ;;  %vm1029_vm5 = vcmp.lt.s32.totalorder %v771_v5, 16 }
 0x1a4   : > { %v491_v63 = vsel %vm371_vm2, %v488_v59, %v490_v62  ;;  %v492_v1 = vsel %vm371_vm2, %v490_v62, %v488_v59 }
 0x1a5   : > { %627 = vmatpush.msk.msra.mxu2 %vm784_vm3, %v491_v63  ;;  %635 = vmatpush.msk.msra.mxu3 %vm792_vm4, %v492_v1 }
 0x1a7   : > { %511 = vmatpush.msra.mxu2 %v483_v3  ;;  %636 = vmatpush.msk.msra.mxu3 %vm255_vm0, %v484_v4  ;;  %vm1025_vm0 = vcmp.lt.s32.totalorder %v771_v5, 1 }
 0x1a8   : > { %vm1026_vm2 = vmmov %vm1025_vm0 }
 0x1aa   : > { %v474_v9 = vpop.permute.xlu1 %473  ;;  %v440_v14 = vpop.permute.xlu2 %439 }
 0x1ab   : > { %v472_v10 = vpop.permute.xlu0 %471 }
 0x1ac   : > { %v475_v11 = vsel %vm345_vm7, %v472_v10, %v474_v9  ;;  %v476_v12 = vsel %vm345_vm7, %v474_v9, %v472_v10  ;;  %vm1030_vm7 = vmmov %vm1029_vm5 }
 0x1ad   : > { %628 = vmatpush.msk.msra.mxu2 %vm814_vm8, %v475_v11  ;;  %637 = vmatpush.msk.msra.mxu3 %vm822_vm9, %v476_v12 }
 0x1b2   : > { %v456_v15 = vpop.permute.xlu1 %455  ;;  %v434_v30 = vpop.permute.xlu2 %433 }
 0x1b3   : > { %v466_v16 = vpop.permute.xlu0 %465  ;;  %v460_v20 = vsel %vm1025_vm0, %v458_v7, %v456_v15  ;;  %v459_v21 = vsel %vm1026_vm2, %v456_v15, %v458_v7 }
 0x1b4   : > { %v467_v17 = vsel %vm332_vm10, %v464_v6, %v466_v16  ;;  %v468_v19 = vsel %vm332_vm10, %v466_v16, %v464_v6 }
 0x1b5   : > { %629 = vmatpush.msk.msra.mxu2 %vm784_vm3, %v467_v17  ;;  %638 = vmatpush.msk.msra.mxu3 %vm779_vm1, %v468_v19  ;;  %vm1027_vm3 = vcmp.lt.s32.totalorder %v771_v5, 15 }
 0x1b6   : > { %vm1028_vm4 = vmmov %vm1027_vm3 }
 0x1b7   : > { %514 = vmatpush.msra.mxu2 %v429_v57  ;;  %534 = vmatpush.msra.mxu3 %v430_v58 }
 0x1b9   : > { %630 = vmatpush.msk.msra.mxu2 %vm814_vm8, %v460_v20  ;;  %639 = vmatpush.msk.msra.mxu3 %vm797_vm6, %v459_v21 }
 0x1ba   : > { %v450_v22 = vpop.permute.xlu1 %449 }
 0x1bb   : > { %v448_v24 = vpop.permute.xlu0 %447 }
 0x1bc   : > { %v452_v25 = vsel %vm1027_vm3, %v450_v22, %v448_v24  ;;  %v451_v26 = vsel %vm1028_vm4, %v448_v24, %v450_v22 }
 0x1bd   : > { %631 = vmatpush.msk.msra.mxu2 %vm861_vm14, %v452_v25  ;;  %640 = vmatpush.msk.msra.mxu3 %vm779_vm1, %v451_v26 }
 0x1c2   : > { %v432_v23 = vpop.permute.xlu1 %431 }
 0x1c3   : > { %v442_v27 = vpop.permute.xlu0 %441  ;;  %v436_v13 = vsel %vm280_vm13, %v434_v30, %v432_v23  ;;  %v435_v32 = vsel %vm280_vm13, %v432_v23, %v434_v30 }
 0x1c4   : > { %v444_v28 = vsel %vm1029_vm5, %v442_v27, %v440_v14  ;;  %v443_v29 = vsel %vm1030_vm7, %v440_v14, %v442_v27 }
 0x1c5   : > { %632 = vmatpush.msk.msra.mxu2 %vm252_vm12, %v444_v28  ;;  %537 = vmatpush.msra.mxu3 %v443_v29 }
 0x1c7   : > { %633 = vmatpush.msk.msra.mxu2 %vm889_vm11, %v436_v13  ;;  %641 = vmatpush.msk.msra.mxu3 %vm797_vm6, %v435_v32 }
 0x1c8   : > { %634 = vmatmul.msk.f32.vlgmr.msra.gmra.mxu2 %vm385_vm15, %v269_v31  ;;  %642 = vmatmul.msk.f32.vlgmr.msra.gmra.mxu3 %vm385_vm15, %v269_v31 }
 0x1cb   : > { %v498_v33 = vpop.permute.xlu0 %497 }
 0x24b   : > { %v520_v34 = vpop.f32.mrf.mxu2  ;;  %v540_v35 = vpop.f32.mrf.mxu3 }
 0x24c   : > { %v521_v36 = vadd.f32 %v520_v34, %v498_v33  ;;  %v541_v37 = vadd.f32 %v540_v35, %v498_v33 }
 0x24e   : > { %v543_v5 = vadd.f32 %v521_v36, %v729_v0  ;;  %v544_v38 = vadd.f32 %v541_v37, %v738_v2 }
 0x250   : > { %545 = vst [vmem:[%s224_s17] sm:$0xff] %v543_v5 }
 0x251   : > { %546 = vst [vmem:[%s224_s17 + $0x8] sm:$0xff] %v544_v38 }
 0x252 PF: > { %s15_s18 = sadd.s32 1, %s672_s18  }
 0x253   : > { %p12_p4 = scmp.ge.s32.totalorder %s15_s18, 4  }
 0x255   :  { %14 = sbr.rel (!%p12_p4) target bundleno = 1 (0x1), region = 70 }

</bundles_post_ra>
